<compile_context>
chip_gen: v5e
topology: v5e:2x2
jax: 0.10.0
libtpu: 0.0.40
codegen_flags: <defaults>
</compile_context>

<pallas_src>
import functools

import jax
import jax.numpy as jnp
import numpy as np
from jax.experimental import pallas as pl
from jax.experimental.pallas import tpu as pltpu


def _round_up(v, m):
    return ((v + m - 1) // m) * m


def _softmax_rows(z):
    # nn.Softmax(dim=1) on [rows, K]; exact reciprocal (zero-cost accuracy win).
    z = z - jnp.max(z, axis=-1, keepdims=True)
    e = jnp.exp(z)
    return e / jnp.sum(e, axis=-1, keepdims=True)


def _head_kernel(bt, a_sub, a, avg_pool,
                 x_ref, w_ref, attr_ref,
                 attn_ref, pre_final_ref, out_final_ref, pre_l4_ref, cls_l4_ref,
                 ale_scr):
    """One grid step == `bt` images.

    x_ref:    [bt, C, HW]     layer4 features, NCHW with spatial flattened.
    w_ref:    [2*a_sub, C]    rows [0:A]          = ALE_vector,
                              rows [a_sub:a_sub+A] = prototype_vectors['layer4']
                              (rows zero-padded to an 8-aligned split); resident.
    attr_ref: [A, K]          class attribute matrix (f32), resident.
    attn_ref: [bt, A, HW]     attention['layer4'] - already NCHW.
    ale_scr:  [bt, A, HW] f32 scratch holding the ALE conv for pooling.
    """
    w = w_ref[...]
    # Unrolled per-image 1x1 convs; both convs fused into a single MXU matmul
    # so the x panel is pushed once per image.  f32 accumulation.
    for b in range(bt):
        conv = jnp.dot(w, x_ref[b], preferred_element_type=jnp.float32)  # [2*a_sub, HW]
        ale_scr[b] = conv[:a]
        attn_ref[b] = conv[a_sub:a_sub + a]

    conv_ale = ale_scr[...]                         # [bt, A, HW] f32
    conv_proto = attn_ref[...]                      # [bt, A, HW] f32

    # Pooling over the spatial axis of the f32 conv output (exact f32 mean even
    # when compute dtype is bf16).
    if avg_pool:
        pre_final = jnp.mean(conv_ale, axis=2)      # F.avg_pool2d(kernel_size=7)
    else:
        pre_final = jnp.max(conv_ale, axis=2)       # F.max_pool2d(kernel_size=7)
    pre_l4 = jnp.max(conv_proto, axis=2)            # F.max_pool2d(kernel_size=7)

    attr = attr_ref[...]
    pre_final_ref[...] = pre_final[:, None, :]
    pre_l4_ref[...] = pre_l4[:, None, :]
    out_final_ref[...] = _softmax_rows(
        jnp.dot(pre_final, attr, preferred_element_type=jnp.float32))[:, None, :]
    cls_l4_ref[...] = _softmax_rows(
        jnp.dot(pre_l4, attr, preferred_element_type=jnp.float32))[:, None, :]


def prepare_weights(ale_vector, proto_vector, attribute,
                    compute_dtype=jnp.bfloat16):
    """Packs the 1x1-conv weights once.  Hoist / cache this across forward calls
    (review: avoid re-materializing padded weights every call)."""
    A = ale_vector.shape[0]
    C = ale_vector.shape[1]
    a_sub = _round_up(A, 8)                      # 8-aligned row split for the fused conv
    pad = ((0, a_sub - A), (0, 0))
    w_ale = jnp.pad(ale_vector.reshape(A, C).astype(jnp.float32), pad)
    w_proto = jnp.pad(proto_vector.reshape(A, C).astype(jnp.float32), pad)
    w_cat = jnp.concatenate([w_ale, w_proto], axis=0).astype(compute_dtype)  # [2*a_sub, C]
    attr = attribute.astype(jnp.float32)                                     # [A, K]
    return w_cat, attr, a_sub


def resnet_proto_iou_forward(x_layer4, attribute, ale_vector=None, proto_vector=None,
                             avg_pool=True, compute_dtype=jnp.bfloat16,
                             block_batch=8, prepared=None,
                             vmem_limit_bytes=32 * 1024 * 1024):
    """Mirrors resnet_proto_IoU.forward from the layer4 feature map onward.

    x_layer4: [B, C, H, W] (NCHW, PyTorch convention) - no layout change needed.
    Returns (output_final, pre_attri, attention, pre_class); attention['layer4']
    is NCHW like the PyTorch module.
    """
    B, C, H, W = x_layer4.shape
    A, K = attribute.shape
    HW = H * W

    # Free reshape (no transpose).  Pass x already in compute_dtype upstream to
    # avoid this cast's HBM round trip.
    x_flat = x_layer4.reshape(B, C, HW)
    if x_flat.dtype != compute_dtype:
        x_flat = x_flat.astype(compute_dtype)

    if prepared is None:
        prepared = prepare_weights(ale_vector, proto_vector, attribute, compute_dtype)
    w_cat, attr, a_sub = prepared

    bt = max(1, min(block_batch, B))
    grid = (pl.cdiv(B, bt),)

    kernel = functools.partial(_head_kernel, bt, a_sub, A, avg_pool)

    out_shape = (
        jax.ShapeDtypeStruct((B, A, HW), jnp.float32),   # attention (NCHW, spatial flat)
        jax.ShapeDtypeStruct((B, 1, A), jnp.float32),    # pre_attri['final']
        jax.ShapeDtypeStruct((B, 1, K), jnp.float32),    # output_final
        jax.ShapeDtypeStruct((B, 1, A), jnp.float32),    # pre_attri['layer4']
        jax.ShapeDtypeStruct((B, 1, K), jnp.float32),    # pre_class['layer4']
    )
    in_specs = [
        pl.BlockSpec((bt, C, HW), lambda g: (g, 0, 0)),        # x tile (double-buffered)
        pl.BlockSpec((2 * a_sub, C), lambda g: (0, 0)),        # fused weights, VMEM-resident
        pl.BlockSpec((A, K), lambda g: (0, 0)),                # attributes, VMEM-resident
    ]
    out_specs = [
        pl.BlockSpec((bt, A, HW), lambda g: (g, 0, 0)),
        pl.BlockSpec((bt, 1, A), lambda g: (g, 0, 0)),
        pl.BlockSpec((bt, 1, K), lambda g: (g, 0, 0)),
        pl.BlockSpec((bt, 1, A), lambda g: (g, 0, 0)),
        pl.BlockSpec((bt, 1, K), lambda g: (g, 0, 0)),
    ]

    attn, pre_final, out_final, pre_l4, cls_l4 = pl.pallas_call(
        kernel,
        grid=grid,
        in_specs=in_specs,
        out_specs=out_specs,
        out_shape=out_shape,
        scratch_shapes=[pltpu.VMEM((bt, A, HW), jnp.float32)],
        compiler_params=pltpu.CompilerParams(
            dimension_semantics=("parallel",),     # v7x: consider pltpu.CORE_PARALLEL
            vmem_limit_bytes=vmem_limit_bytes),    # v5e default (16 MiB) is too small
    )(x_flat, w_cat, attr)

    attention = {"layer4": attn.reshape(B, A, H, W)}   # already NCHW; no slice/transpose
    pre_attri = {"final": pre_final[:, 0, :], "layer4": pre_l4[:, 0, :]}
    pre_class = {"layer4": cls_l4[:, 0, :]}
    return out_final[:, 0, :], pre_attri, attention, pre_class


def _reference_numpy(x_nchw, attribute, ale_vector, proto_vector, avg_pool):
    """Deterministic numpy reference of the PyTorch forward (from layer4 on)."""
    x = np.asarray(x_nchw, np.float32)
    attr = np.asarray(attribute, np.float32)
    A = ale_vector.shape[0]
    C = x.shape[1]
    w_ale = np.asarray(ale_vector, np.float32).reshape(A, C)
    w_proto = np.asarray(proto_vector, np.float32).reshape(A, C)
    conv_ale = np.einsum("bchw,ac->bahw", x, w_ale)
    conv_proto = np.einsum("bchw,ac->bahw", x, w_proto)
    pre_final = conv_ale.mean(axis=(2, 3)) if avg_pool else conv_ale.max(axis=(2, 3))
    pre_l4 = conv_proto.max(axis=(2, 3))

    def softmax(z):
        z = z - z.max(axis=1, keepdims=True)
        e = np.exp(z)
        return e / e.sum(axis=1, keepdims=True)

    return (softmax(pre_final @ attr), pre_final, conv_proto, pre_l4,
            softmax(pre_l4 @ attr))


if __name__ == "__main__":
    # Small stand-in shapes (module uses B x 2048 x 7 x 7 feats, 312 attrs for CUB).
    B, C, H, W = 4, 32, 7, 7
    A, K = 16, 8

    key = jax.random.PRNGKey(0)
    k_x, k_attr, k_ale, k_proto = jax.random.split(key, 4)

    x_layer4 = jax.random.normal(k_x, (B, C, H, W), dtype=jnp.float32)
    attribute = jax.random.uniform(k_attr, (A, K), dtype=jnp.float32)
    # __init__: 0.0002 * torch.rand([A, C, 1, 1])
    ale_vector = 0.0002 * jax.random.uniform(k_ale, (A, C, 1, 1), dtype=jnp.float32)
    proto_vector = 0.0002 * jax.random.uniform(k_proto, (A, C, 1, 1), dtype=jnp.float32)

    # f32 path (tight tolerances); block_batch=2 -> grid=(2,) exercises the
    # multi-step pipeline with resident weights.
    for avg_pool in (True, False):
        output_final, pre_attri, attention, pre_class = jax.block_until_ready(
            resnet_proto_iou_forward(x_layer4, attribute, ale_vector, proto_vector,
                                     avg_pool=avg_pool, compute_dtype=jnp.float32,
                                     block_batch=2))
        r_out, r_pre_final, r_attn, r_pre_l4, r_cls_l4 = _reference_numpy(
            x_layer4, attribute, ale_vector, proto_vector, avg_pool)

        assert np.allclose(np.asarray(pre_attri["final"]), r_pre_final,
                           atol=1e-5, rtol=1e-4), f"pre_final avg_pool={avg_pool}"
        assert np.allclose(np.asarray(pre_attri["layer4"]), r_pre_l4,
                           atol=1e-5, rtol=1e-4), f"pre_l4 avg_pool={avg_pool}"
        assert np.allclose(np.asarray(attention["layer4"]), r_attn,
                           atol=1e-5, rtol=1e-4), f"attention avg_pool={avg_pool}"
        assert np.allclose(np.asarray(output_final), r_out,
                           atol=1e-5, rtol=1e-4), f"output_final avg_pool={avg_pool}"
        assert np.allclose(np.asarray(pre_class["layer4"]), r_cls_l4,
                           atol=1e-5, rtol=1e-4), f"pre_class avg_pool={avg_pool}"

    # Default path: bf16 inputs/weights, f32 accumulation, default batch tile.
    # Reference is computed on the same bf16-rounded inputs, so only the
    # accumulation path differs.
    x_bf16 = x_layer4.astype(jnp.bfloat16)
    out_bf = jax.block_until_ready(
        resnet_proto_iou_forward(x_bf16, attribute, ale_vector, proto_vector,
                                 avg_pool=True))
    x_r = np.asarray(x_bf16.astype(jnp.float32))
    ale_r = np.asarray(ale_vector.astype(jnp.bfloat16).astype(jnp.float32))
    proto_r = np.asarray(proto_vector.astype(jnp.bfloat16).astype(jnp.float32))
    rb_out, rb_pre_final, rb_attn, rb_pre_l4, rb_cls_l4 = _reference_numpy(
        x_r, attribute, ale_r, proto_r, True)

    out_final_b, pre_attri_b, attention_b, pre_class_b = out_bf
    assert np.allclose(np.asarray(attention_b["layer4"]), rb_attn,
                       atol=2e-5, rtol=5e-3), "bf16 attention"
    assert np.allclose(np.asarray(pre_attri_b["final"]), rb_pre_final,
                       atol=2e-5, rtol=5e-3), "bf16 pre_final"
    assert np.allclose(np.asarray(pre_attri_b["layer4"]), rb_pre_l4,
                       atol=2e-5, rtol=5e-3), "bf16 pre_l4"
    assert np.allclose(np.asarray(out_final_b), rb_out,
                       atol=2e-5, rtol=5e-3), "bf16 output_final"
    assert np.allclose(np.asarray(pre_class_b["layer4"]), rb_cls_l4,
                       atol=2e-5, rtol=5e-3), "bf16 pre_class"

    print("KERNEL_OK")
</pallas_src>

<mosaic_0001>
module attributes {stable_mosaic.version = 11 : i64} {
  func.func @_head_kernel(%arg0: i32, %arg1: memref<2x32x49xf32, #tpu.memory_space<vmem>>, %arg2: memref<32x32xf32, #tpu.memory_space<vmem>>, %arg3: memref<16x8xf32, #tpu.memory_space<vmem>>, %arg4: memref<2x16x49xf32, #tpu.memory_space<vmem>>, %arg5: memref<2x1x16xf32, #tpu.memory_space<vmem>>, %arg6: memref<2x1x8xf32, #tpu.memory_space<vmem>>, %arg7: memref<2x1x16xf32, #tpu.memory_space<vmem>>, %arg8: memref<2x1x8xf32, #tpu.memory_space<vmem>>, %arg9: memref<2x16x49xf32, #tpu.memory_space<vmem>>) attributes {dimension_semantics = [#tpu.dimension_semantics<parallel>], iteration_bounds = array<i64: 2>, scalar_prefetch = 0 : i64, scratch_operands = 1 : i64, tpu.core_type = #tpu.core_type<tc>, window_params = [{transform_indices = @transform_0, window_bounds = array<i64: 2, 32, 49>}, {pipeline_mode = #tpu.pipeline_mode<synchronous>, transform_indices = @transform_1, window_bounds = array<i64: 32, 32>}, {pipeline_mode = #tpu.pipeline_mode<synchronous>, transform_indices = @transform_2, window_bounds = array<i64: 16, 8>}, {transform_indices = @transform_3, window_bounds = array<i64: 2, 16, 49>}, {transform_indices = @transform_4, window_bounds = array<i64: 2, 1, 16>}, {transform_indices = @transform_5, window_bounds = array<i64: 2, 1, 8>}, {transform_indices = @transform_6, window_bounds = array<i64: 2, 1, 16>}, {transform_indices = @transform_7, window_bounds = array<i64: 2, 1, 8>}]} {
    %c0 = arith.constant 0 : index
    %c0_0 = arith.constant 0 : index
    %0 = vector.load %arg2[%c0, %c0_0] : memref<32x32xf32, #tpu.memory_space<vmem>>, vector<32x32xf32>
    %c0_1 = arith.constant 0 : index
    %c0_2 = arith.constant 0 : index
    %c0_3 = arith.constant 0 : index
    %1 = vector.load %arg1[%c0_1, %c0_2, %c0_3] : memref<2x32x49xf32, #tpu.memory_space<vmem>>, vector<1x32x49xf32>
    %2 = vector.shape_cast %1 : vector<1x32x49xf32> to vector<32x49xf32>
    %cst = arith.constant dense<0.000000e+00> : vector<32x49xf32>
    %3 = tpu.matmul %0, %2, %cst {dimension_numbers = #tpu.dot_dimension_numbers<[1], [0], [0], [1], [0, 0, 1, 1], [], []>} : vector<32x32xf32>, vector<32x49xf32>, vector<32x49xf32> -> vector<32x49xf32>
    %4 = vector.extract_strided_slice %3 {offsets = [0, 0], sizes = [16, 49], strides = [1, 1]} : vector<32x49xf32> to vector<16x49xf32>
    %c0_4 = arith.constant 0 : index
    %c0_5 = arith.constant 0 : index
    %c0_6 = arith.constant 0 : index
    %5 = vector.load %arg9[%c0_4, %c0_5, %c0_6] : memref<2x16x49xf32, #tpu.memory_space<vmem>>, vector<1x16x49xf32>
    %6 = vector.shape_cast %5 : vector<1x16x49xf32> to vector<16x49xf32>
    %7 = vector.shape_cast %4 : vector<16x49xf32> to vector<1x16x49xf32>
    tpu.vector_store %arg9[%c0_4, %c0_5, %c0_6], %7 {strides = array<i32>} : memref<2x16x49xf32, #tpu.memory_space<vmem>>, vector<1x16x49xf32>,
    %8 = vector.extract_strided_slice %3 {offsets = [16, 0], sizes = [16, 49], strides = [1, 1]} : vector<32x49xf32> to vector<16x49xf32>
    %c0_7 = arith.constant 0 : index
    %c0_8 = arith.constant 0 : index
    %c0_9 = arith.constant 0 : index
    %9 = vector.load %arg4[%c0_7, %c0_8, %c0_9] : memref<2x16x49xf32, #tpu.memory_space<vmem>>, vector<1x16x49xf32>
    %10 = vector.shape_cast %9 : vector<1x16x49xf32> to vector<16x49xf32>
    %11 = vector.shape_cast %8 : vector<16x49xf32> to vector<1x16x49xf32>
    tpu.vector_store %arg4[%c0_7, %c0_8, %c0_9], %11 {strides = array<i32>} : memref<2x16x49xf32, #tpu.memory_space<vmem>>, vector<1x16x49xf32>,
    %c1 = arith.constant 1 : index
    %c0_10 = arith.constant 0 : index
    %c0_11 = arith.constant 0 : index
    %12 = vector.load %arg1[%c1, %c0_10, %c0_11] : memref<2x32x49xf32, #tpu.memory_space<vmem>>, vector<1x32x49xf32>
    %13 = vector.shape_cast %12 : vector<1x32x49xf32> to vector<32x49xf32>
    %cst_12 = arith.constant dense<0.000000e+00> : vector<32x49xf32>
    %14 = tpu.matmul %0, %13, %cst_12 {dimension_numbers = #tpu.dot_dimension_numbers<[1], [0], [0], [1], [0, 0, 1, 1], [], []>} : vector<32x32xf32>, vector<32x49xf32>, vector<32x49xf32> -> vector<32x49xf32>
    %15 = vector.extract_strided_slice %14 {offsets = [0, 0], sizes = [16, 49], strides = [1, 1]} : vector<32x49xf32> to vector<16x49xf32>
    %c1_13 = arith.constant 1 : index
    %c0_14 = arith.constant 0 : index
    %c0_15 = arith.constant 0 : index
    %16 = vector.load %arg9[%c1_13, %c0_14, %c0_15] : memref<2x16x49xf32, #tpu.memory_space<vmem>>, vector<1x16x49xf32>
    %17 = vector.shape_cast %16 : vector<1x16x49xf32> to vector<16x49xf32>
    %18 = vector.shape_cast %15 : vector<16x49xf32> to vector<1x16x49xf32>
    tpu.vector_store %arg9[%c1_13, %c0_14, %c0_15], %18 {strides = array<i32>} : memref<2x16x49xf32, #tpu.memory_space<vmem>>, vector<1x16x49xf32>,
    %19 = vector.extract_strided_slice %14 {offsets = [16, 0], sizes = [16, 49], strides = [1, 1]} : vector<32x49xf32> to vector<16x49xf32>
    %c1_16 = arith.constant 1 : index
    %c0_17 = arith.constant 0 : index
    %c0_18 = arith.constant 0 : index
    %20 = vector.load %arg4[%c1_16, %c0_17, %c0_18] : memref<2x16x49xf32, #tpu.memory_space<vmem>>, vector<1x16x49xf32>
    %21 = vector.shape_cast %20 : vector<1x16x49xf32> to vector<16x49xf32>
    %22 = vector.shape_cast %19 : vector<16x49xf32> to vector<1x16x49xf32>
    tpu.vector_store %arg4[%c1_16, %c0_17, %c0_18], %22 {strides = array<i32>} : memref<2x16x49xf32, #tpu.memory_space<vmem>>, vector<1x16x49xf32>,
    %c0_19 = arith.constant 0 : index
    %c0_20 = arith.constant 0 : index
    %c0_21 = arith.constant 0 : index
    %23 = vector.load %arg9[%c0_19, %c0_20, %c0_21] : memref<2x16x49xf32, #tpu.memory_space<vmem>>, vector<2x16x49xf32>
    %c0_22 = arith.constant 0 : index
    %c0_23 = arith.constant 0 : index
    %c0_24 = arith.constant 0 : index
    %24 = vector.load %arg4[%c0_22, %c0_23, %c0_24] : memref<2x16x49xf32, #tpu.memory_space<vmem>>, vector<2x16x49xf32>
    %cst_25 = arith.constant dense<0.000000e+00> : vector<2x16xf32>
    %25 = vector.multi_reduction <add>, %23, %cst_25 [2] : vector<2x16x49xf32> to vector<2x16xf32>
    %cst_26 = arith.constant 4.900000e+01 : f32
    %26 = vector.broadcast %cst_26 : f32 to vector<2x16xf32>
    %27 = arith.divf %25, %26 : vector<2x16xf32>
    %cst_27 = arith.constant dense<0xFF800000> : vector<2x16xf32>
    %28 = vector.multi_reduction <maximumf>, %24, %cst_27 [2] : vector<2x16x49xf32> to vector<2x16xf32>
    %c0_28 = arith.constant 0 : index
    %c0_29 = arith.constant 0 : index
    %29 = vector.load %arg3[%c0_28, %c0_29] : memref<16x8xf32, #tpu.memory_space<vmem>>, vector<16x8xf32>
    %30 = vector.shape_cast %27 : vector<2x16xf32> to vector<2x1x16xf32>
    %c0_30 = arith.constant 0 : index
    %c0_31 = arith.constant 0 : index
    %c0_32 = arith.constant 0 : index
    %31 = vector.load %arg5[%c0_30, %c0_31, %c0_32] : memref<2x1x16xf32, #tpu.memory_space<vmem>>, vector<2x1x16xf32>
    tpu.vector_store %arg5[%c0_30, %c0_31, %c0_32], %30 {strides = array<i32>} : memref<2x1x16xf32, #tpu.memory_space<vmem>>, vector<2x1x16xf32>,
    %32 = vector.shape_cast %28 : vector<2x16xf32> to vector<2x1x16xf32>
    %c0_33 = arith.constant 0 : index
    %c0_34 = arith.constant 0 : index
    %c0_35 = arith.constant 0 : index
    %33 = vector.load %arg7[%c0_33, %c0_34, %c0_35] : memref<2x1x16xf32, #tpu.memory_space<vmem>>, vector<2x1x16xf32>
    tpu.vector_store %arg7[%c0_33, %c0_34, %c0_35], %32 {strides = array<i32>} : memref<2x1x16xf32, #tpu.memory_space<vmem>>, vector<2x1x16xf32>,
    %cst_36 = arith.constant dense<0.000000e+00> : vector<2x8xf32>
    %34 = tpu.matmul %27, %29, %cst_36 {dimension_numbers = #tpu.dot_dimension_numbers<[1], [0], [0], [1], [0, 0, 1, 1], [], []>} : vector<2x16xf32>, vector<16x8xf32>, vector<2x8xf32> -> vector<2x8xf32>
    %cst_37 = arith.constant dense<0xFF800000> : vector<2xf32>
    %35 = vector.multi_reduction <maximumf>, %34, %cst_37 [1] : vector<2x8xf32> to vector<2xf32>
    %36 = vector.shape_cast %35 : vector<2xf32> to vector<2x1xf32>
    %37 = vector.broadcast %36 : vector<2x1xf32> to vector<2x8xf32>
    %38 = arith.subf %34, %37 : vector<2x8xf32>
    %39 = math.exp %38 : vector<2x8xf32>
    %cst_38 = arith.constant dense<0.000000e+00> : vector<2xf32>
    %40 = vector.multi_reduction <add>, %39, %cst_38 [1] : vector<2x8xf32> to vector<2xf32>
    %41 = vector.shape_cast %40 : vector<2xf32> to vector<2x1xf32>
    %42 = vector.broadcast %41 : vector<2x1xf32> to vector<2x8xf32>
    %43 = arith.divf %39, %42 : vector<2x8xf32>
    %44 = vector.shape_cast %43 : vector<2x8xf32> to vector<2x1x8xf32>
    %c0_39 = arith.constant 0 : index
    %c0_40 = arith.constant 0 : index
    %c0_41 = arith.constant 0 : index
    %45 = vector.load %arg6[%c0_39, %c0_40, %c0_41] : memref<2x1x8xf32, #tpu.memory_space<vmem>>, vector<2x1x8xf32>
    tpu.vector_store %arg6[%c0_39, %c0_40, %c0_41], %44 {strides = array<i32>} : memref<2x1x8xf32, #tpu.memory_space<vmem>>, vector<2x1x8xf32>,
    %cst_42 = arith.constant dense<0.000000e+00> : vector<2x8xf32>
    %46 = tpu.matmul %28, %29, %cst_42 {dimension_numbers = #tpu.dot_dimension_numbers<[1], [0], [0], [1], [0, 0, 1, 1], [], []>} : vector<2x16xf32>, vector<16x8xf32>, vector<2x8xf32> -> vector<2x8xf32>
    %cst_43 = arith.constant dense<0xFF800000> : vector<2xf32>
    %47 = vector.multi_reduction <maximumf>, %46, %cst_43 [1] : vector<2x8xf32> to vector<2xf32>
    %48 = vector.shape_cast %47 : vector<2xf32> to vector<2x1xf32>
    %49 = vector.broadcast %48 : vector<2x1xf32> to vector<2x8xf32>
    %50 = arith.subf %46, %49 : vector<2x8xf32>
    %51 = math.exp %50 : vector<2x8xf32>
    %cst_44 = arith.constant dense<0.000000e+00> : vector<2xf32>
    %52 = vector.multi_reduction <add>, %51, %cst_44 [1] : vector<2x8xf32> to vector<2xf32>
    %53 = vector.shape_cast %52 : vector<2xf32> to vector<2x1xf32>
    %54 = vector.broadcast %53 : vector<2x1xf32> to vector<2x8xf32>
    %55 = arith.divf %51, %54 : vector<2x8xf32>
    %56 = vector.shape_cast %55 : vector<2x8xf32> to vector<2x1x8xf32>
    %c0_45 = arith.constant 0 : index
    %c0_46 = arith.constant 0 : index
    %c0_47 = arith.constant 0 : index
    %57 = vector.load %arg8[%c0_45, %c0_46, %c0_47] : memref<2x1x8xf32, #tpu.memory_space<vmem>>, vector<2x1x8xf32>
    tpu.vector_store %arg8[%c0_45, %c0_46, %c0_47], %56 {strides = array<i32>} : memref<2x1x8xf32, #tpu.memory_space<vmem>>, vector<2x1x8xf32>,
    return
  }
  func.func @transform_0(%arg0: i32) -> (i32, i32, i32) {
    %c0_i32 = arith.constant 0 : i32
    %c0_i32_0 = arith.constant 0 : i32
    %c0_i32_1 = arith.constant 0 : i32
    return %arg0, %c0_i32, %c0_i32_0 : i32, i32, i32
  }
  func.func @transform_1(%arg0: i32) -> (i32, i32) {
    %c0_i32 = arith.constant 0 : i32
    %c0_i32_0 = arith.constant 0 : i32
    %c0_i32_1 = arith.constant 0 : i32
    return %c0_i32, %c0_i32_0 : i32, i32
  }
  func.func @transform_2(%arg0: i32) -> (i32, i32) {
    %c0_i32 = arith.constant 0 : i32
    %c0_i32_0 = arith.constant 0 : i32
    %c0_i32_1 = arith.constant 0 : i32
    return %c0_i32, %c0_i32_0 : i32, i32
  }
  func.func @transform_3(%arg0: i32) -> (i32, i32, i32) {
    %c0_i32 = arith.constant 0 : i32
    %c0_i32_0 = arith.constant 0 : i32
    %c0_i32_1 = arith.constant 0 : i32
    return %arg0, %c0_i32, %c0_i32_0 : i32, i32, i32
  }
  func.func @transform_4(%arg0: i32) -> (i32, i32, i32) {
    %c0_i32 = arith.constant 0 : i32
    %c0_i32_0 = arith.constant 0 : i32
    %c0_i32_1 = arith.constant 0 : i32
    return %arg0, %c0_i32, %c0_i32_0 : i32, i32, i32
  }
  func.func @transform_5(%arg0: i32) -> (i32, i32, i32) {
    %c0_i32 = arith.constant 0 : i32
    %c0_i32_0 = arith.constant 0 : i32
    %c0_i32_1 = arith.constant 0 : i32
    return %arg0, %c0_i32, %c0_i32_0 : i32, i32, i32
  }
  func.func @transform_6(%arg0: i32) -> (i32, i32, i32) {
    %c0_i32 = arith.constant 0 : i32
    %c0_i32_0 = arith.constant 0 : i32
    %c0_i32_1 = arith.constant 0 : i32
    return %arg0, %c0_i32, %c0_i32_0 : i32, i32, i32
  }
  func.func @transform_7(%arg0: i32) -> (i32, i32, i32) {
    %c0_i32 = arith.constant 0 : i32
    %c0_i32_0 = arith.constant 0 : i32
    %c0_i32_1 = arith.constant 0 : i32
    return %arg0, %c0_i32, %c0_i32_0 : i32, i32, i32
  }
}

</mosaic_0001>

<bundles_post_ra>
// kernel: tpu_custom_call.1
= control target key start
LH: loop header
LB: loop body
LE: loop exit
PB: predicated region body
PF: predicated region fallthrough
CT: control target
= control target key end

     0   :  { %s1718_s0 = inlined_call_operand.hbm [shape: f32[4,32,49], index: 0, kind: input, shape index: {}]   ;;  %s1719_s1 = inlined_call_operand.hbm [shape: f32[32,32], index: 1, kind: input, shape index: {}]   ;;  %s1720_s2 = inlined_call_operand.vmem [shape: f32[16,8], index: 2, kind: input, shape index: {}]   ;;  %s1721_s3 = inlined_call_operand.hbm [shape: f32[4,16,49], index: 3, kind: output, shape index: {0}]   ;;  %s1722_s4 = inlined_call_operand.hbm [shape: f32[4,1,16], index: 4, kind: output, shape index: {1}]   ;;  %s1723_s5 = inlined_call_operand.hbm [shape: f32[4,1,8], index: 5, kind: output, shape index: {2}]   ;;  %s1724_s6 = inlined_call_operand.hbm [shape: f32[4,1,16], index: 6, kind: output, shape index: {3}]   ;;  %s1725_s7 = inlined_call_operand.hbm [shape: f32[4,1,8], index: 7, kind: output, shape index: {4}]  }
   0x1   :  { %1733 = sst [smem:[#allocation24_spill]] %s1718_s0 }
   0x2   :  { %1734 = sst [smem:[#allocation25_spill]] %s1719_s1 }
   0x3   :  { %1735 = sst [smem:[#allocation26_spill]] %s1720_s2 }
   0x4   :  { %1736 = sst [smem:[#allocation27_spill]] %s1722_s4 }
   0x5   :  { %13 = vsyncpa [#allocation4], 0 }
   0x6   :  { %15 = vsyncpa [#allocation4 + $0x1], 0 }
   0x7   :  { %16 = vsyncpa [#allocation7], 0 }
   0x8   :  { %17 = vsyncpa [#allocation5], 0 }
   0x9   :  { %19 = vsyncpa [#allocation5 + $0x1], 0 }
   0xa   :  { %20 = vsyncpa [#allocation10], 0 }
   0xb   :  { %22 = vsyncpa [#allocation10 + $0x1], 0 }
   0xc   :  { %23 = vsyncpa [#allocation13], 0 }
   0xd   :  { %25 = vsyncpa [#allocation13 + $0x1], 0  ;;  %s1401_s24 = smov 0   ;;  %s1403_s25 = smov 0  }
   0xe   :  { %s1405_s26 = smov 0   ;;  %s1407_s27 = smov 0  }
   0xf LB: > { %1737 = sst [smem:[#allocation20_spill]] %s1343_s25  ;;  %s1422_s28 = sadd.s32 4294967295, %s1351_s27   ;;  %s1351_s27 = sphi %s1407_s27, %s1755_s27   ;;  %s1347_s26 = sphi %s1405_s26, %s1758_s26   ;;  %s1343_s25 = sphi %s1403_s25, %s1757_s25   ;;  %s1339_s24 = sphi %s1401_s24, %s1756_s24  }
  0x10   : > { %1738 = sst [smem:[#allocation21_spill]] %s1347_s26  ;;  %s1726_s29 = sadd.s32 4294967294, %s1351_s27  }
  0x11   : > { %p51_p0 = scmp.ne.s32.totalorder %s1343_s25, %s1339_s24  ;;  %p52_p1 = scmp.eq.s32.totalorder %s1422_s28, 0 }
  0x12   : > { %p117_p2 = scmp.eq.s32.totalorder %s1422_s28, 1  ;;  %p123_p3 = scmp.eq.s32.totalorder %s1726_s29, 1 }
  0x13   : > { %p1433_p4 = por %p52_p1, %p51_p0  ;;  %p950_p5 = scmp.ge.s32.totalorder %s1351_s27, 1 }
  0x14   : > { %p1438_p6 = por %p123_p3, %p51_p0  ;;  %p234_p7 = scmp.lt.s32.totalorder %s1351_s27, 3 }
  0x15   : > { %s1741_s1 = sld [smem:[#allocation25_spill]]  ;;  %s1353_s13 = smov [#allocation6]  }
  0x16   : > { %p1446_p8 = pnand %p950_p5, %p234_p7  ;;  %s247_s14 = sshll.u32 %s1353_s13, 4  ;;  %s248_s14 = int_to_ptr.vmem [resolvable:$true] %s247_s14 }
  0x17   : > { %s1456_s15 = sadd.s32 1, %s1351_s27   ;;  %s1727_s16 = smov 128  }
  0x18   : > { %p1023_p9 = pneg %p1446_p8  ;;  %1743 = sst [smem:[#allocation22_spill]] %s1456_s15 }
  0x19   : > { %s1728_s17 = smov 8   ;;  %s35_s18 = ssub.s32 %s1351_s27, %s1456_s15 }
  0x1a   : > { %p1024_p10 = pnand %p1023_p9, %p52_p1  ;;  %s38_s19 = sadd.s32 1, %s1347_s26 }
  0x1b   : > { %s245_s11 = sshll.u32 %s1741_s1, 4  ;;  %p36_p12 = scmp.eq.s32.totalorder %s35_s18, 0  ;;  %s246_s11 = int_to_ptr.hbm [resolvable:$true] %s245_s11 }
  0x1c   : > { %1026 = dma.hbm_to_vmem [thread:$0]  (!%p1024_p10), %s246_s11, 512, %s248_s14, [#allocation7], %s1727_s16, %s1727_s16, %s1728_s17  }
  0x1d   : > { %p45_p13 = scmp.ne.s32.totalorder %s1347_s26, %s1343_s25  ;;  %p46_p0 = scmp.eq.s32.totalorder %s1351_s27, 0 }
  0x1e   : > { %s1468_s20 = scalar_select %p36_p12, %s1347_s26, %s38_s19  }
  0x1f   : > { %p1472_p3 = por %p117_p2, %p45_p13  ;;  %p1048_p5 = scmp.lt.s32.totalorder %s1351_s27, 2 }
  0x20   : > { %1744 = sst [smem:[#allocation23_spill]] %s1468_s20  ;;  %s264_s22 = sand.u32 1, %s1347_s26  }
  0x21   : > { %s996_s23 = sshll.u32 %s1351_s27, 6  ;;  %p47_p7 = por %p46_p0, %p45_p13 }
  0x22   : > { %s953_s9 = sshll.u32 %s264_s22, 6  ;;  %s1746_s0 = sld [smem:[#allocation24_spill]] }
  0x23   : > { %s268_s18 = scalar_lea.vmem [#allocation3], %s953_s9  ;;  %p1482_p9 = pnand %p1048_p5, %p47_p7 }
  0x24   : > { %s277_s29 = sshll.u32 %s268_s18, 4  ;;  %s265_s16 = scalar_lea.sflag [#allocation4], %s264_s22  ;;  %s278_s29 = int_to_ptr.vmem [resolvable:$true] %s277_s29 }
  0x25   : > { %p1135_p10 = pneg %p1482_p9 }
  0x28   : > { %s274_s11 = scalar_lea.hbm %s1746_s0, %s996_s23  ;;  %s1138_s9 = scalar_lea.hbm %s1746_s0, 128 }
  0x29   : > { %s275_s14 = sshll.u32 %s274_s11, 4  ;;  %s276_s14 = int_to_ptr.hbm [resolvable:$true] %s275_s14 }
  0x2a   : > { %s1131_s17 = sshra.s32 %s276_s14, 4  ;;  %s1132_s17 = int_to_ptr.hbm [resolvable:$true] %s1131_s17 }
  0x2b   : > { %s1133_s1 = scalar_lea.hbm %s1132_s17, 64  ;;  %p1139_p0 = scmp.lt.s32.totalorder %s1132_s17, %s1746_s0 }
  0x2c   : > { %p1134_p2 = scmp.ne.s32.totalorder %s1132_s17, %s1133_s1  ;;  %p1140_p5 = scmp.lt.s32.totalorder %s1138_s9, %s1133_s1 }
  0x2e   : > { %p1136_p12 = pnand %p1135_p10, %p1134_p2  ;;  %p1141_p7 = por %p1140_p5, %p1139_p0 }
  0x30   : > { %p1137_p13 = pneg %p1136_p12 }
  0x32   : > { %p1142_p11 = pnand %p1141_p7, %p1137_p13 }
  0x34   : > { %1145 = shalt.err (!%p1142_p11)
}
  0x35   : > { %s1748_s22 = smov 8   ;;  %s1749_s18 = smov 128  }
  0x36   : > { %1030 = dma.hbm_to_vmem [thread:$0]  (!%p1482_p9), %s276_s14, 1024, %s278_s29, %s265_s16, %s1749_s18, %s1749_s18, %s1748_s22  }
  0x37   : > { %289 = sbr.rel (%p1446_p8) target bundleno = 753 (0x2f1), region = 32  ;;  %s1502_s23 = sand.u32 (!%p1446_p8), 1, %s1343_s25  }
  0x38   : > { %s958_s17 = sshll.u32 (!%p1446_p8), %s1502_s23, 6  ;;  %s292_s1 = scalar_lea.sflag (!%p1446_p8), [#allocation4], %s1502_s23 }
  0x39   : > { %s295_s10 = scalar_lea.vmem (!%p1446_p8), [#allocation3], %s958_s17 }
  0x3c   : > { %1318 = dma.done.wait (%p1433_p4), %s292_s1, 1024  }
  0x3d   : > { %1320 = vsyncadd (%p1433_p4), %s292_s1, 4294966272 }
  0x3e   : > { %1322 = dma.done.wait (%p52_p1), [#allocation7], 512  }
  0x3f   : > { %1324 = vsyncadd (%p52_p1), [#allocation7], 4294966784  ;;  %v365_v0 = vld [vmem:[%s295_s10 + $0x18] sm:$0xff]  ;;  %v364_v2 = vld [vmem:[%s295_s10 + $0x10] sm:$0xff]  ;;  %vm366_vm0 = vcmask 261120   ;;  %vm408_vm1 = vcmask 400384   ;;  %v502_v45 = vlaneseq }
  0x40   : > { %v972_v1 = vld [vmem:[%s295_s10 + $0x38] sm:$0xff]  ;;  %391 = vmatpush.msra.mxu0 %v365_v0  ;;  %v971_v3 = vld [vmem:[%s295_s10 + $0x30] sm:$0xff]  ;;  %v363_v4 = vld [vmem:[%s295_s10 + $0x8] sm:$0xff]  ;;  %999 = vmatpush.msra.mxu2 %v365_v0  ;;  %s960_s29 = sshll.u32 %s1502_s23, 5  ;;  %v1356_v36 = vmov 49.0   ;;  %s1750_s2 = sld [smem:[#allocation26_spill]] }
  0x41   : > { %430 = vmatpush.msra.mxu1 %v972_v1  ;;  %v970_v5 = vld [vmem:[%s295_s10 + $0x28] sm:$0xff]  ;;  %1003 = vmatpush.msra.mxu3 %v972_v1  ;;  %v362_v6 = vld [vmem:[%s295_s10] sm:$0xff]  ;;  %v361_v9 = vld [vmem:[#allocation6 + $0x18] sm:$0xff]  ;;  %s1529_s30 = scalar_lea.vmem [#allocation8], %s960_s29  ;;  %1091 = vrcp.f32 %v1356_v36  ;;  %v503_v48 = vand.u32 127, %v502_v45  ;;  %s1556_s9 = sshll.u32 %s1502_s23, 1 }
  0x42   : > { %392 = vmatpush.msra.mxu0 %v364_v2  ;;  %v969_v7 = vld [vmem:[%s295_s10 + $0x20] sm:$0xff]  ;;  %1000 = vmatpush.msra.mxu2 %v364_v2  ;;  %v359_v10 = vld [vmem:[#allocation6 + $0x8] sm:$0xff]  ;;  %v360_v11 = vld [vmem:[#allocation6 + $0x10] sm:$0xff]  ;;  %vm507_vm3 = vcmask 130112   ;;  %vm514_vm4 = vcmask 122880   ;;  %vm531_vm5 = vcmask 1041409  }
  0x43   : > { %431 = vmatpush.msra.mxu1 %v971_v3  ;;  %1004 = vmatpush.msra.mxu3 %v971_v3  ;;  %v358_v8 = vld [vmem:[#allocation6] sm:$0xff]  ;;  %v505_v51 = vadd.s32 4294967288, %v503_v48  ;;  %vm533_vm6 = vcmask 130048   ;;  %s1561_s13 = scalar_lea.vmem [#allocation9], %s1556_s9  ;;  %s1571_s11 = scalar_lea.vmem [#allocation12], %s1556_s9  ;;  %vm556_vm7 = vcmask 58368  }
  0x44   : > { %393 = vmatpush.msra.mxu0 %v363_v4  ;;  %1001 = vmatpush.msra.mxu2 %v363_v4  ;;  %s1592_s18 = sshll.u32 %s1422_s28, 1  ;;  %s1751_s4 = sld [smem:[#allocation27_spill]] }
  0x45   : > { %432 = vmatpush.msra.mxu1 %v970_v5  ;;  %1005 = vmatpush.msra.mxu3 %v970_v5  ;;  %s720_s16 = scalar_lea.hbm %s1724_s6, %s1592_s18  ;;  %s644_s14 = sand.u32 1, %s1422_s28  }
  0x46   : > { %394 = vmatpush.msra.mxu0 %v362_v6  ;;  %1002 = vmatpush.msra.mxu2 %v362_v6  ;;  %v497_v37 = vld [vmem:[%s1750_s2 + $0x8] sm:$0xff]  ;;  %v496_v38 = vld [vmem:[%s1750_s2] sm:$0xff]  ;;  %s689_s19 = sshll.u32 %s1561_s13, 4  ;;  %s1604_s2 = scalar_lea.sflag [#allocation10], %s644_s14  ;;  %s690_s19 = int_to_ptr.vmem [resolvable:$true] %s689_s19 }
  0x47   : > { %433 = vmatpush.msra.mxu1 %v969_v7  ;;  %965 = vmatmul.msk.f32.vlgmr.msra.gmra.mxu0 %vm366_vm0, %v358_v8  ;;  %v1092_v39 = vpop.eup %1091 }
  0x48   : > { %973 = vmatmul.msk.f32.vlgmr.msra.gmra.mxu1 %vm366_vm0, %v358_v8  ;;  %1006 = vmatpush.msra.mxu3 %v969_v7  ;;  %v474_v40 = vmul.f32 49.0, %v1092_v39  ;;  %vm478_vm2 = vweird.f32 %v1092_v39 }
  0x49   : > { %968 = vmatmul.msk.f32.vlgmr.msra.gmra.mxu2 %vm366_vm0, %v361_v9  ;;  %976 = vmatmul.msk.f32.vlgmr.msra.gmra.mxu3 %vm366_vm0, %v361_v9 }
  0x4a   : > { %550 = vmatpush.msrb.mxu2 %v497_v37  ;;  %604 = vmatpush.msrb.mxu3 %v497_v37  ;;  %v475_v41 = vsub.f32 1.0, %v474_v40  ;;  %s688_s10 = scalar_lea.hbm %s1751_s4, %s1592_s18  ;;  %s1181_s26 = scalar_lea.hbm %s1751_s4, 4 }
  0x4b   : > { %s691_s0 = sshll.u32 %s688_s10, 4  ;;  %s692_s0 = int_to_ptr.hbm [resolvable:$true] %s691_s0 }
  0x4c   : > { %551 = vmatpush.msrb.mxu2 %v496_v38  ;;  %605 = vmatpush.msrb.mxu3 %v496_v38  ;;  %v476_v42 = vmul.f32 %v1092_v39, %v475_v41  ;;  %s1175_s22 = sshra.s32 %s692_s0, 4  ;;  %s1176_s22 = int_to_ptr.hbm [resolvable:$true] %s1175_s22 }
  0x4d   : > { %s1177_s20 = scalar_lea.hbm %s1176_s22, 2  ;;  %p1182_p11 = scmp.lt.s32.totalorder %s1176_s22, %s1751_s4 }
  0x4e   : > { %v477_v43 = vadd.f32 %v1092_v39, %v476_v42  ;;  %p1178_p1 = scmp.ne.s32.totalorder %s1176_s22, %s1177_s20  ;;  %p1183_p9 = scmp.lt.s32.totalorder %s1181_s26, %s1177_s20 }
  0x4f   : > { %966 = vmatmul.msk.f32.gmra.mxu0 %vm366_vm0, %v359_v10 }
  0x50   : > { %974 = vmatmul.msk.f32.gmra.mxu1 %vm366_vm0, %v359_v10  ;;  %v479_v47 = vsel %vm478_vm2, %v1092_v39, %v477_v43  ;;  %p1179_p4 = pnand %p1178_p1, %p1472_p3  ;;  %p1184_p2 = por %p1183_p9, %p1182_p11 }
  0x52   : > { %p1180_p8 = pneg %p1179_p4 }
  0x54   : > { %p1185_p10 = pnand %p1184_p2, %p1180_p8 }
  0x57   : > { %967 = vmatmul.msk.f32.gmra.mxu0 %vm366_vm0, %v360_v11 }
  0x58   : > { %975 = vmatmul.msk.f32.gmra.mxu1 %vm366_vm0, %v360_v11 }
  0xc4   : > { %v396_v12 = vpop.f32.mrf.mxu0 }
  0xc5   : > { %v435_v13 = vpop.f32.mrf.mxu1  ;;  %409 = vst.msk [vmem:[#allocation2] sm:$0xff] %vm408_vm1, %v396_v12 }
  0xc6   : > { %448 = vst.msk [vmem:[#allocation2 + $0x10] sm:$0xff] %vm408_vm1, %v435_v13 }
  0xcc   : > { %v399_v14 = vpop.f32.mrf.mxu0  ;;  %v453_v16 = vld [vmem:[#allocation2] sm:$0xff]  ;;  %v405_v19 = vpop.f32.mrf.mxu2 }
  0xcd   : > { %v438_v15 = vpop.f32.mrf.mxu1  ;;  %410 = vst.msk [vmem:[#allocation2 + $0x8] sm:$0xff] %vm408_vm1, %v399_v14  ;;  %v455_v17 = vld [vmem:[#allocation2 + $0x10] sm:$0xff]  ;;  %v461_v18 = vsel %vm408_vm1, %v453_v16, 0.0  ;;  %v444_v20 = vpop.f32.mrf.mxu3 }
  0xce   : > { %449 = vst.msk [vmem:[#allocation2 + $0x18] sm:$0xff] %vm408_vm1, %v438_v15  ;;  %v467_v21 = vsel %vm408_vm1, %v455_v17, 0.0  ;;  %462 = vadd.xlane.f32.xlu0 %v461_v18 }
  0xcf   : > { %468 = vadd.xlane.f32.xlu1 %v467_v21  ;;  %412 = vst.msk [vmem:[%s1529_s30 + $0x8] sm:$0xff] %vm408_vm1, %v405_v19 }
  0xd0   : > { %978 = vst.msk [vmem:[%s1529_s30 + $0x18] sm:$0xff] %vm408_vm1, %v444_v20 }
  0xd4   : > { %v402_v22 = vpop.f32.mrf.mxu0  ;;  %v454_v23 = vld [vmem:[#allocation2 + $0x8] sm:$0xff] }
  0xd5   : > { %v441_v24 = vpop.f32.mrf.mxu1  ;;  %411 = vst.msk [vmem:[%s1529_s30] sm:$0xff] %vm408_vm1, %v402_v22  ;;  %v456_v25 = vld [vmem:[#allocation2 + $0x18] sm:$0xff]  ;;  %v464_v26 = vsel %vm408_vm1, %v454_v23, 0.0 }
  0xd6   : > { %v470_v27 = vsel %vm408_vm1, %v456_v25, 0.0  ;;  %465 = vadd.xlane.f32.xlu0 %v464_v26  ;;  %977 = vst.msk [vmem:[%s1529_s30 + $0x10] sm:$0xff] %vm408_vm1, %v441_v24  ;;  %v458_v34 = vld [vmem:[%s1529_s30 + $0x8] sm:$0xff] }
  0xd7   : > { %471 = vadd.xlane.f32.xlu1 %v470_v27  ;;  %v460_v28 = vld [vmem:[%s1529_s30 + $0x18] sm:$0xff]  ;;  %v487_v35 = vsel %vm408_vm1, %v458_v34, -inf }
  0xd8   : > { %v493_v30 = vsel %vm408_vm1, %v460_v28, -inf }
  0xdc   : > { %v457_v29 = vld [vmem:[%s1529_s30] sm:$0xff] }
  0xdd   : > { %v484_v31 = vsel %vm408_vm1, %v457_v29, -inf  ;;  %v459_v32 = vld [vmem:[%s1529_s30 + $0x10] sm:$0xff] }
  0xde   : > { %485 = vmax.xlane.f32.xlu2 %v484_v31  ;;  %v490_v33 = vsel %vm408_vm1, %v459_v32, -inf }
  0xdf   : > { %494 = vmax.xlane.f32.xlu1 %v493_v30  ;;  %491 = vmax.xlane.f32.xlu0 %v490_v33 }
  0xe6   : > { %488 = vmax.xlane.f32.xlu2 %v487_v35 }
 0x141   : > { %v463_v44 = vpop.xlane.xlu0 %462 }
 0x142   : > { %v469_v46 = vpop.xlane.xlu1 %468  ;;  %v480_v50 = vmul.f32 %v479_v47, %v463_v44 }
 0x143   : > { %v482_v49 = vmul.f32 %v479_v47, %v469_v46 }
 0x144   : > { %v504_v57 = vperm.slane %v480_v50, %v503_v48 }
 0x145   : > { %v509_v55 = vperm.slane %v482_v49, %v503_v48 }
 0x149   : > { %v466_v52 = vpop.xlane.xlu0 %465 }
 0x14a   : > { %v472_v53 = vpop.xlane.xlu1 %471  ;;  %v481_v54 = vmul.f32 %v479_v47, %v466_v52 }
 0x14b   : > { %v483_v56 = vmul.f32 %v479_v47, %v472_v53 }
 0x14c   : > { %v506_v58 = vperm.slane %v481_v54, %v505_v51 }
 0x14d   : > { %v510_v59 = vperm.slane %v483_v56, %v505_v51 }
 0x14e   : > { %v508_v60 = vsel %vm507_vm3, %v506_v58, %v504_v57 }
 0x14f   : > { %v511_v61 = vsel %vm507_vm3, %v510_v59, %v509_v55  ;;  %515 = vst.msk [vmem:[%s1561_s13] sm:$0x1] %vm514_vm4, %v508_v60 }
 0x150   : > { %516 = vst.msk [vmem:[%s1561_s13 + $0x1] sm:$0x1] %vm514_vm4, %v511_v61  ;;  %v532_v62 = vsel %vm531_vm5, %v511_v61, %v508_v60 }
 0x151   : > { %979 = vmatmul.msk.f32.vlgmr.msrb.gmra.mxu2 %vm533_vm6, %v532_v62  ;;  %v486_v63 = vpop.xlane.xlu2 %485 }
 0x152   : > { %v495_v0 = vpop.xlane.xlu1 %494  ;;  %v492_v1 = vpop.xlane.xlu0 %491  ;;  %v521_v6 = vperm.slane %v486_v63, %v503_v48 }
 0x153   : > { %v525_v2 = vperm.slane %v495_v0, %v505_v51  ;;  %v524_v3 = vperm.slane %v492_v1, %v503_v48 }
 0x155   : > { %v526_v4 = vsel %vm507_vm3, %v525_v2, %v524_v3 }
 0x156   : > { %530 = vst.msk [vmem:[%s1571_s11 + $0x1] sm:$0x1] %vm514_vm4, %v526_v4 }
 0x159   : > { %v489_v5 = vpop.xlane.xlu2 %488 }
 0x15a   : > { %v522_v7 = vperm.slane %v489_v5, %v505_v51 }
 0x15c   : > { %v523_v8 = vsel %vm507_vm3, %v522_v7, %v521_v6 }
 0x15d   : > { %529 = vst.msk [vmem:[%s1571_s11] sm:$0x1] %vm514_vm4, %v523_v8  ;;  %v587_v9 = vsel %vm531_vm5, %v526_v4, %v523_v8 }
 0x15e   : > { %980 = vmatmul.msk.f32.vlgmr.msrb.gmra.mxu3 %vm533_vm6, %v587_v9 }
 0x1d4   : > { %v553_v10 = vpop.f32.mrf.mxu2 }
 0x1d5   : > { %v557_v11 = vsel %vm556_vm7, %v553_v10, -inf }
 0x1d6   : > { %558 = vmax.xlane.f32.xlu2 %v557_v11 }
 0x1e1   : > { %v607_v12 = vpop.f32.mrf.mxu3 }
 0x1e2   : > { %v610_v13 = vsel %vm556_vm7, %v607_v12, -inf }
 0x1e3   : > { %611 = vmax.xlane.f32.xlu0 %v610_v13 }
 0x249   : > { %v559_v14 = vpop.xlane.xlu2 %558 }
 0x24a   : > { %v560_v15 = vsub.f32 %v553_v10, %v559_v14 }
 0x24c   : > { %v561_v16 = vmul.f32 1.442695, %v560_v15 }
 0x24e   : > { %1093 = vpow2.f32 %v561_v16 }
 0x254   : > { %v1582_v17 = vpop.eup %1093 }
 0x255   : > { %v563_v18 = vsel %vm556_vm7, %v1582_v17, 0.0 }
 0x256   : > { %564 = vadd.xlane.f32.xlu1 %v563_v18  ;;  %v612_v19 = vpop.xlane.xlu0 %611 }
 0x257   : > { %v613_v20 = vsub.f32 %v607_v12, %v612_v19 }
 0x259   : > { %v614_v21 = vmul.f32 1.442695, %v613_v20 }
 0x25b   : > { %1095 = vpow2.f32 %v614_v21 }
 0x261   : > { %v1586_v22 = vpop.eup %1095 }
 0x262   : > { %v616_v23 = vsel %vm556_vm7, %v1586_v22, 0.0 }
 0x263   : > { %617 = vadd.xlane.f32.xlu2 %v616_v23 }
 0x264   : > { %1188 = shalt.err (!%p1185_p10)
}
 0x265   : > { %s1357_s13 = smov 16   ;;  %s1358_s10 = smov 1  }
 0x266   : > { %1014 = dma.vmem_to_hbm [thread:$0]  (%p1472_p3), %s690_s19, 32, %s692_s0, %s1604_s2, %s1357_s13, %s1357_s13, %s1358_s10  }
 0x267   : > { %s1752_s17 = sshll.u32 %s1571_s11, 4  ;;  %s723_s1 = sshll.u32 %s720_s16, 4  ;;  %s722_s17 = int_to_ptr.vmem [resolvable:$true] %s1752_s17  ;;  %s724_s1 = int_to_ptr.hbm [resolvable:$true] %s723_s1 }
 0x268   : > { %s998_s26 = sshll.u32 %s1422_s28, 5  ;;  %s1623_s20 = scalar_lea.sflag [#allocation13], %s644_s14 }
 0x269   : > { %s1203_s22 = sshra.s32 %s724_s1, 4  ;;  %s1209_s25 = scalar_lea.hbm %s1724_s6, 4  ;;  %s1204_s22 = int_to_ptr.hbm [resolvable:$true] %s1203_s22 }
 0x26a   : > { %s1205_s29 = scalar_lea.hbm %s1204_s22, 2  ;;  %p1210_p5 = scmp.lt.s32.totalorder %s1204_s22, %s1724_s6 }
 0x26b   : > { %p1206_p12 = scmp.ne.s32.totalorder %s1204_s22, %s1205_s29  ;;  %p1211_p7 = scmp.lt.s32.totalorder %s1209_s25, %s1205_s29 }
 0x26d   : > { %p1207_p13 = pnand %p1206_p12, %p1472_p3  ;;  %p1212_p1 = por %p1211_p7, %p1210_p5 }
 0x26f   : > { %p1208_p0 = pneg %p1207_p13 }
 0x271   : > { %p1213_p4 = pnand %p1212_p1, %p1208_p0 }
 0x273   : > { %1216 = shalt.err (!%p1213_p4)
}
 0x274   : > { %1016 = dma.vmem_to_hbm [thread:$0]  (%p1472_p3), %s722_s17, 32, %s724_s1, %s1623_s20, %s1357_s13, %s1357_s13, %s1358_s10  }
 0x275   : > { %s672_s11 = scalar_lea.hbm %s1721_s3, %s998_s26  ;;  %s673_s15 = sshll.u32 %s1529_s30, 4  ;;  %s674_s15 = int_to_ptr.vmem [resolvable:$true] %s673_s15 }
 0x276   : > { %s675_s25 = sshll.u32 %s672_s11, 4  ;;  %s640_s16 = scalar_lea.sflag [#allocation5], %s1502_s23  ;;  %s676_s25 = int_to_ptr.hbm [resolvable:$true] %s675_s25 }
 0x277   : > { %s1231_s14 = sshra.s32 %s676_s25, 4  ;;  %s1237_s17 = scalar_lea.hbm %s1721_s3, 64  ;;  %s1232_s14 = int_to_ptr.hbm [resolvable:$true] %s1231_s14 }
 0x278   : > { %s1233_s19 = scalar_lea.hbm %s1232_s14, 32  ;;  %p1238_p2 = scmp.lt.s32.totalorder %s1232_s14, %s1721_s3 }
 0x279   : > { %p1234_p8 = scmp.ne.s32.totalorder %s1232_s14, %s1233_s19  ;;  %p1239_p10 = scmp.lt.s32.totalorder %s1237_s17, %s1233_s19 }
 0x27b   : > { %p1235_p11 = pnand %p1234_p8, %p1472_p3  ;;  %p1240_p12 = por %p1239_p10, %p1238_p2 }
 0x27d   : > { %p1236_p9 = pneg %p1235_p11 }
 0x27f   : > { %p1241_p13 = pnand %p1240_p12, %p1236_p9 }
 0x281   : > { %1244 = shalt.err (!%p1241_p13)
}
 0x282   : > { %s1359_s23 = smov 128   ;;  %s1360_s30 = smov 8   ;;  %vm584_vm12 = vcmask 57344  }
 0x283   : > { %1013 = dma.vmem_to_hbm [thread:$0]  (%p1472_p3), %s674_s15, 512, %s676_s25, %s640_s16, %s1359_s23, %s1359_s23, %s1360_s30  }
 0x284   : > { %s704_s4 = scalar_lea.hbm %s1723_s5, %s1592_s18  ;;  %s337_s28 = scalar_lea.vmem [#allocation11], %s1556_s9 }
 0x285   : > { %s705_s11 = sshll.u32 %s337_s28, 4  ;;  %s707_s15 = sshll.u32 %s704_s4, 4  ;;  %s706_s11 = int_to_ptr.vmem [resolvable:$true] %s705_s11  ;;  %s708_s15 = int_to_ptr.hbm [resolvable:$true] %s707_s15 }
 0x286   : > { %s1259_s25 = sshra.s32 %s708_s15, 4  ;;  %s1265_s22 = scalar_lea.hbm %s1723_s5, 4  ;;  %s1260_s25 = int_to_ptr.hbm [resolvable:$true] %s1259_s25 }
 0x287   : > { %s1261_s16 = scalar_lea.hbm %s1260_s25, 2  ;;  %p1266_p1 = scmp.lt.s32.totalorder %s1260_s25, %s1723_s5 }
 0x288   : > { %p1262_p0 = scmp.ne.s32.totalorder %s1260_s25, %s1261_s16  ;;  %p1267_p4 = scmp.lt.s32.totalorder %s1265_s22, %s1261_s16 }
 0x28a   : > { %p1263_p5 = pnand %p1262_p0, %p1472_p3  ;;  %p1268_p8 = por %p1267_p4, %p1266_p1 }
 0x28c   : > { %p1264_p7 = pneg %p1263_p5 }
 0x28e   : > { %p1269_p11 = pnand %p1268_p8, %p1264_p7 }
 0x2c9   : > { %v565_v24 = vpop.xlane.xlu1 %564 }
 0x2ca   : > { %1097 = vrcp.f32 %v565_v24  ;;  %v577_v28 = vand.u32 2147483648, %v565_v24  ;;  %v575_v30 = vand.u32 2147483647, %v565_v24  ;;  %vm571_vm9 = vweird.f32 %v565_v24 }
 0x2cc   : > { %v578_v33 = vor.u32 1.1754944e-38, %v577_v28  ;;  %vm576_vm11 = vcmp.eq.f32.partialorder %v575_v30, 8.507059e+37 }
 0x2d0   : > { %v1098_v25 = vpop.eup %1097 }
 0x2d1   : > { %v567_v26 = vmul.f32 %v1098_v25, %v565_v24  ;;  %vm572_vm8 = vweird.f32 %v1098_v25 }
 0x2d2   : > { %vm573_vm10 = vmor %vm571_vm9, %vm572_vm8 }
 0x2d3   : > { %v568_v27 = vsub.f32 1.0, %v567_v26 }
 0x2d5   : > { %v569_v29 = vmul.f32 %v1098_v25, %v568_v27 }
 0x2d6   : > { %v618_v31 = vpop.xlane.xlu2 %617 }
 0x2d7   : > { %v570_v32 = vadd.f32 %v1098_v25, %v569_v29  ;;  %1099 = vrcp.f32 %v618_v31 }
 0x2d9   : > { %v574_v34 = vsel %vm573_vm10, %v1098_v25, %v570_v32 }
 0x2da   : > { %v579_v35 = vsel %vm576_vm11, %v578_v33, %v574_v34 }
 0x2db   : > { %v580_v36 = vmul.f32 %v1582_v17, %v579_v35 }
 0x2dd   : > { %v1100_v37 = vpop.eup %1099  ;;  %v582_v38 = vrot.slane %v580_v36, 1  ;;  %585 = vst.msk [vmem:[%s337_s28] sm:$0x1] %vm584_vm12, %v580_v36 }
 0x2de   : > { %v620_v39 = vmul.f32 %v1100_v37, %v618_v31 }
 0x2df   : > { %586 = vst.msk [vmem:[%s337_s28 + $0x1] sm:$0x1] %vm584_vm12, %v582_v38 }
 0x2e0   : > { %v621_v40 = vsub.f32 1.0, %v620_v39 }
 0x2e1   : > { %1272 = shalt.err (!%p1269_p11)
}
 0x2e2   : > { %1015 = dma.vmem_to_hbm [thread:$0]  (%p1472_p3), %s706_s11, 32, %s708_s15, %s1604_s2, %s1357_s13, %s1357_s13, %s1358_s10   ;;  %v630_v41 = vand.u32 2147483648, %v618_v31  ;;  %v622_v42 = vmul.f32 %v1100_v37, %v621_v40  ;;  %vm625_vm13 = vweird.f32 %v1100_v37  ;;  %v628_v43 = vand.u32 2147483647, %v618_v31 }
 0x2e3   : > { %vm624_vm14 = vweird.f32 %v618_v31  ;;  %s736_s23 = scalar_lea.hbm %s1725_s7, %s1592_s18  ;;  %s351_s30 = scalar_lea.vmem [#allocation14], %s1556_s9 }
 0x2e4   : > { %v623_v44 = vadd.f32 %v1100_v37, %v622_v42  ;;  %vm626_vm15 = vmor %vm624_vm14, %vm625_vm13  ;;  %v631_v45 = vor.u32 1.1754944e-38, %v630_v41  ;;  %vm629_vm0 = vcmp.eq.f32.partialorder %v628_v43, 8.507059e+37  ;;  %s737_s26 = sshll.u32 %s351_s30, 4  ;;  %s739_s0 = sshll.u32 %s736_s23, 4  ;;  %s738_s26 = int_to_ptr.vmem [resolvable:$true] %s737_s26  ;;  %s740_s0 = int_to_ptr.hbm [resolvable:$true] %s739_s0 }
 0x2e5   : > { %s1287_s2 = sshra.s32 %s740_s0, 4  ;;  %s1293_s28 = scalar_lea.hbm %s1725_s7, 4  ;;  %s1288_s2 = int_to_ptr.hbm [resolvable:$true] %s1287_s2 }
 0x2e6   : > { %v627_v46 = vsel %vm626_vm15, %v1100_v37, %v623_v44  ;;  %s1289_s18 = scalar_lea.hbm %s1288_s2, 2  ;;  %p1294_p12 = scmp.lt.s32.totalorder %s1288_s2, %s1725_s7 }
 0x2e7   : > { %v632_v47 = vsel %vm629_vm0, %v631_v45, %v627_v46  ;;  %p1290_p9 = scmp.ne.s32.totalorder %s1288_s2, %s1289_s18  ;;  %p1295_p13 = scmp.lt.s32.totalorder %s1293_s28, %s1289_s18 }
 0x2e8   : > { %v633_v48 = vmul.f32 %v1586_v22, %v632_v47 }
 0x2e9   : > { %p1291_p2 = pnand %p1290_p9, %p1472_p3  ;;  %p1296_p0 = por %p1295_p13, %p1294_p12 }
 0x2ea   : > { %v635_v49 = vrot.slane %v633_v48, 1  ;;  %637 = vst.msk [vmem:[%s351_s30] sm:$0x1] %vm584_vm12, %v633_v48 }
 0x2eb   : > { %p1292_p10 = pneg %p1291_p2 }
 0x2ec   : > { %638 = vst.msk [vmem:[%s351_s30 + $0x1] sm:$0x1] %vm584_vm12, %v635_v49 }
 0x2ed   : > { %p1297_p5 = pnand %p1296_p0, %p1292_p10 }
 0x2ef   : > { %1300 = shalt.err (!%p1297_p5)
}
 0x2f0   : > { %1017 = dma.vmem_to_hbm [thread:$0]  (%p1472_p3), %s738_s26, 32, %s740_s0, %s1623_s20, %s1357_s13, %s1357_s13, %s1358_s10  }
 0x2f1 PF: > { %s754_s25 = sand.u32 1, %s1339_s24   ;;  %p1753_p7 = scmp.ge.s32.totalorder %s1351_s27, 2 }
 0x2f2   : > { %s755_s16 = scalar_lea.sflag [#allocation5], %s754_s25 }
 0x2f3   : > { %p1032_p1 = pnand %p1753_p7, %p1438_p6 }
 0x2f5   : > { %p1033_p4 = pneg %p1032_p1 }
 0x2f7   : > { %1326 = dma.done.wait (%p1033_p4), %s755_s16, 512  }
 0x2f8   : > { %1328 = vsyncadd (%p1033_p4), %s755_s16, 4294966784  ;;  %s1754_s14 = sadd.s32 4294967294, %s1351_s27  }
 0x2f9   : > { %s764_s21 = sand.u32 1, %s1754_s14  }
 0x2fa   : > { %s765_s19 = scalar_lea.sflag [#allocation10], %s764_s21 }
 0x2fb   : > { %1330 = dma.done.wait (%p1033_p4), %s765_s19, 64  }
 0x2fc   : > { %1332 = vsyncadd (%p1033_p4), %s765_s19, 4294967232  ;;  %s785_s22 = scalar_lea.sflag [#allocation13], %s764_s21 }
 0x2fd   : > { %1334 = dma.done.wait (%p1033_p4), %s785_s22, 64  }
 0x2fe   : > { %1336 = vsyncadd (%p1033_p4), %s785_s22, 4294967232  ;;  %s1755_s27 = sld [smem:[#allocation22_spill]] }
 0x2ff   : > { %s1756_s24 = sld [smem:[#allocation20_spill]] }
 0x300   : > { %s1757_s25 = sld [smem:[#allocation21_spill]] }
 0x301   : > { %s1758_s26 = sld [smem:[#allocation23_spill]] }
 0x304   : > { %p28_p3 = scmp.ge.s32.totalorder %s1755_s27, 4  }
 0x306   :  { %30 = sbr.rel (!%p28_p3) target bundleno = 15 (0xf), region = 148 }
 0x30b   :  { %801 = vsyncpa [#allocation4], 1 }
 0x30c   :  { %803 = vsyncpa [#allocation4 + $0x1], 1 }
 0x30d   :  { %804 = vsyncpa [#allocation7], 1 }
 0x30e   :  { %805 = vsyncpa [#allocation5], 1 }
 0x30f   :  { %807 = vsyncpa [#allocation5 + $0x1], 1 }
 0x310   :  { %808 = vsyncpa [#allocation10], 1 }
 0x311   :  { %810 = vsyncpa [#allocation10 + $0x1], 1 }
 0x312   :  { %811 = vsyncpa [#allocation13], 1 }
 0x313   :  { %813 = vsyncpa [#allocation13 + $0x1], 1 }

</bundles_post_ra>
